<compile_context>
chip_gen: v5e
topology: v5e:2x2
jax: 0.10.0
libtpu: 0.0.40
codegen_flags: <defaults>
</compile_context>

<pallas_src>
import functools

import numpy as np
import jax
import jax.numpy as jnp
from jax.experimental import pallas as pl
from jax.experimental.pallas import tpu as pltpu

_LANES = 128   # vreg lane width; also the lane-depth of the partial-sum scratch


def _round_up(x, m):
    return ((x + m - 1) // m) * m


def _vmem_capacity_bytes():
    """Per-core VMEM capacity (generation aware); conservative fallback."""
    try:
        cap = getattr(pltpu.get_tpu_info(), "vmem_capacity_bytes", None)
        if cap:
            return int(cap)
    except Exception:
        pass
    return 64 * 1024 * 1024   # v7x has the smallest VMEM (64 MiB / core)


def _pick_batch_tile(B, cap=8):
    """Batch rows per grid step.

    Keeps >= 2 blocks on the parallel batch axis when B >= 2 (so both v7x
    TensorCores get work); larger tB fills accumulator sublanes for big B.
    """
    cap = min(cap, B // 2) if B >= 2 else 1
    cap = max(cap, 1)
    for t in range(cap, 0, -1):
        if B % t == 0:
            return t
    return 1


def _pick_l_tile(L, tB, C, itemsize, l_tile=None):
    """Largest 128-multiple L tile whose double-buffered x block fits the
    (generation-aware) VMEM budget; never larger than L rounded up to 128."""
    l_cap = _round_up(L, _LANES)
    if l_tile is not None:                       # explicit override (tests/tuning)
        return max(_LANES, min(_round_up(int(l_tile), _LANES), l_cap))
    cap = _vmem_capacity_bytes()
    pair_budget = min(8 * 1024 * 1024, max(2 * 1024 * 1024, cap // 8))
    tl = (pair_budget // (2 * tB * C * itemsize)) // _LANES * _LANES
    return max(_LANES, min(tl, l_cap))


# ----------------------------------------------------------------------------
# Fused SharedThreshold kernel
# ----------------------------------------------------------------------------
def _shared_threshold_kernel(x_ref, w1_ref, b1_ref, w2_ref, b2_ref, o_ref,
                             sum_ref, asum_ref, *,
                             inv_l, tl, seq_len, needs_mask):
    """Fused SharedThreshold forward.

    Grid: (B // tB, cdiv(L, tL)).  Axis 0 (batch blocks) is "parallel"
    (megacore), axis 1 (length) is an "arbitrary" reduction axis.

      x_ref  : (tB, C, tL)   current (batch block, L tile) of the input
      w1_ref : (C, H)        fc1 weight, (in, out) layout
      b1_ref : (1, H)        fc1 bias
      w2_ref : (H, C)        fc2 weight, columns pre-tiled over channel groups
      b2_ref : (1, C)        fc2 bias, pre-tiled over channel groups
      o_ref  : (tB, 1, C)    per-channel thresholds for this batch block
      sum_ref, asum_ref : (tB, C, 128) f32 lane-dense partial sums

    Hot loop: stream the x block in (tB, C, 128) chunks and accumulate
    sum(x) / sum(|x|) into lane-dense partials (pure VPU adds — no per-step
    cross-lane reduce, keeps XLU off the critical path).  Finalize (last L
    step): one cross-lane reduce + the tiny FC head + threshold scaling.
    """
    l = pl.program_id(1)

    @pl.when(l == 0)
    def _init():
        sum_ref[...] = jnp.zeros_like(sum_ref)
        asum_ref[...] = jnp.zeros_like(asum_ref)

    tb, ch, cl = sum_ref.shape
    n_chunks = tl // cl
    # Carry the partials in vregs when they are small; otherwise accumulate
    # straight into VMEM scratch (graceful degradation for large tB * C).
    reg_carry = (tb * ch * cl) <= 16 * 1024

    if needs_mask:
        lane = jax.lax.broadcasted_iota(jnp.int32, (tb, ch, cl), 2)
        base = l * tl

    def load_chunk(j):
        blk = x_ref[:, :, j * cl:(j + 1) * cl].astype(jnp.float32)
        if needs_mask:   # zero the invalid tail of the last (partially OOB) L block
            blk = jnp.where(base + j * cl + lane < seq_len, blk, 0.0)
        return blk

    if reg_carry:
        s = sum_ref[...]
        a = asum_ref[...]
        for j in range(n_chunks):
            blk = load_chunk(j)
            s = s + blk
            a = a + jnp.abs(blk)
        sum_ref[...] = s
        asum_ref[...] = a
    else:
        for j in range(n_chunks):
            blk = load_chunk(j)
            sum_ref[...] += blk
            asum_ref[...] += jnp.abs(blk)

    @pl.when(l == pl.num_programs(1) - 1)
    def _finalize():
        gap = jnp.sum(sum_ref[...], axis=2) * inv_l        # (tB, C)  mean(x)
        absmean = jnp.sum(asum_ref[...], axis=2) * inv_l   # (tB, C)  mean|x|
        h = jnp.dot(gap, w1_ref[...],
                    preferred_element_type=jnp.float32) + b1_ref[...]
        h = jnp.maximum(h, 0.0)                            # fc1 + ReLU
        z = jnp.dot(h, w2_ref[...],
                    preferred_element_type=jnp.float32) + b2_ref[...]
        gt = jax.nn.sigmoid(z)                             # (tB, C): chan k -> group k % G
        # C < 128 makes this a masked partial store; one store per batch block,
        # negligible.  Output stays lane-major (C last).
        o_ref[...] = (gt * absmean)[:, None, :].astype(o_ref.dtype)


def shared_threshold(x, fc1_w, fc1_b, fc2_w, fc2_b, *, groups=16, l_tile=None):
    """SharedThreshold forward.

    x     : (B, C, L) float32 (or bf16) in PyTorch NCW layout
    fc1_w : (C, H), fc1_b : (H,)   -- fc1 in (in, out) layout (torch weight.T)
    fc2_w : (H, G), fc2_b : (G,)   -- fc2 in (in, out) layout
    Returns the per-channel threshold, shape (B, C, 1), matching torch.
    """
    B, C, L = x.shape
    H = fc1_w.shape[1]
    G = fc2_w.shape[1]
    assert G == groups and C % groups == 0, "channels must be divisible by groups"
    reps = C // groups

    # Fold torch's `.unsqueeze(2).repeat(1, C//G, 1)` into fc2 itself: sigmoid
    # is elementwise, so replicating the logit columns == replicating the
    # sigmoid outputs.  Column k of the tiled weight/bias uses group k % G,
    # exactly the torch mapping.  (Tiny one-off XLA op on (H,G)/(G,) arrays.)
    w2_tiled = jnp.tile(fc2_w, (1, reps))                 # (H, C)
    b2_tiled = jnp.tile(fc2_b, (reps,)).reshape(1, C)     # (1, C)
    b1 = fc1_b.reshape(1, H)

    itemsize = jnp.dtype(x.dtype).itemsize
    tB = _pick_batch_tile(B)
    tL = _pick_l_tile(L, tB, C, itemsize, l_tile)
    grid = (B // tB, pl.cdiv(L, tL))
    needs_mask = (L % tL) != 0

    # VMEM budget from the actual tiles (double-buffered x block + lane-dense
    # accumulators + weights + output), 1.5x headroom, capped so it also fits
    # comfortably inside v7x's 64 MiB physical VMEM.
    need = (2 * tB * C * tL * itemsize           # double-buffered x block
            + 2 * tB * C * _LANES * 4            # partial-sum accumulators
            + 2 * 4 * (C * H + H + H * C + C)    # fc weights / biases
            + 2 * tB * C * 4)                    # output block
    vmem_limit = int(min(max(int(need * 1.5), 8 * 1024 * 1024),
                         32 * 1024 * 1024))

    kernel = functools.partial(
        _shared_threshold_kernel,
        inv_l=1.0 / L, tl=tL, seq_len=L, needs_mask=needs_mask)

    thr = pl.pallas_call(
        kernel,
        out_shape=jax.ShapeDtypeStruct((B, 1, C), jnp.float32),
        grid_spec=pltpu.PrefetchScalarGridSpec(
            num_scalar_prefetch=0,
            grid=grid,
            in_specs=[
                pl.BlockSpec((tB, C, tL), lambda b, l: (b, 0, l)),   # x
                pl.BlockSpec((C, H), lambda b, l: (0, 0)),           # fc1 w
                pl.BlockSpec((1, H), lambda b, l: (0, 0)),           # fc1 b
                pl.BlockSpec((H, C), lambda b, l: (0, 0)),           # fc2 w (tiled)
                pl.BlockSpec((1, C), lambda b, l: (0, 0)),           # fc2 b (tiled)
            ],
            out_specs=pl.BlockSpec((tB, 1, C), lambda b, l: (b, 0, 0)),
            scratch_shapes=[pltpu.VMEM((tB, C, _LANES), jnp.float32),
                            pltpu.VMEM((tB, C, _LANES), jnp.float32)],
        ),
        compiler_params=pltpu.CompilerParams(
            dimension_semantics=("parallel", "arbitrary"),
            vmem_limit_bytes=vmem_limit,
        ),
    )(x, fc1_w, b1, w2_tiled, b2_tiled)

    # (B, 1, C) -> (B, C, 1): middle dim is 1, so this reshape matches torch's
    # channel ordering exactly.
    return thr.reshape(B, C, 1)


# ----------------------------------------------------------------------------
# Pure-JAX reference (follows the torch forward literally) for validation
# ----------------------------------------------------------------------------
def shared_threshold_ref(x, fc1_w, fc1_b, fc2_w, fc2_b, groups):
    B, C, L = x.shape
    gap = jnp.mean(x, axis=2)                                  # (B, C)
    h = jnp.maximum(gap @ fc1_w + fc1_b, 0.0)
    gt = jax.nn.sigmoid(h @ fc2_w + fc2_b)                     # (B, G)
    # .unsqueeze(2).repeat(1, C//G, 1).reshape(B, C, 1): channel k -> group k % G
    thr = jnp.tile(gt, (1, C // groups))[:, :, None]           # (B, C, 1)
    return thr * jnp.mean(jnp.abs(x), axis=2, keepdims=True)


# ----------------------------------------------------------------------------
if __name__ == "__main__":
    key = jax.random.PRNGKey(0)
    kx, k1, k2, k3, k4 = jax.random.split(key, 5)

    # Small shapes consistent with the module: C divisible by groups=16 and
    # reduction=16 (hidden = C // 16 = 4).  L = 1920 (not a multiple of the
    # forced l_tile=512), so this single run exercises the multi-step
    # L-accumulation, the tail-block masking, and the 2-block parallel batch
    # axis.  Production calls leave l_tile=None (VMEM-budget-derived tile).
    B, C, L = 2, 64, 1920
    groups, reduction = 16, 16
    H = C // reduction

    x = jax.random.normal(kx, (B, C, L), jnp.float32)
    fc1_w = jax.random.normal(k1, (C, H), jnp.float32) * (1.0 / np.sqrt(C))
    fc1_b = jax.random.normal(k2, (H,), jnp.float32) * 0.1
    fc2_w = jax.random.normal(k3, (H, groups), jnp.float32) * (1.0 / np.sqrt(H))
    fc2_b = jax.random.normal(k4, (groups,), jnp.float32) * 0.1

    fwd = jax.jit(functools.partial(shared_threshold, groups=groups, l_tile=512))
    out = fwd(x, fc1_w, fc1_b, fc2_w, fc2_b)
    jax.block_until_ready(out)

    ref = shared_threshold_ref(x, fc1_w, fc1_b, fc2_w, fc2_b, groups)
    assert out.shape == (B, C, 1) and out.dtype == jnp.float32
    np.testing.assert_allclose(np.asarray(out), np.asarray(ref),
                               rtol=2e-4, atol=2e-5)
    print("KERNEL_OK")
</pallas_src>

<mosaic_0001>
module attributes {stable_mosaic.version = 11 : i64} {
  func.func @_shared_threshold_kernel(%arg0: i32, %arg1: i32, %arg2: memref<1x64x512xf32, #tpu.memory_space<vmem>>, %arg3: memref<64x4xf32, #tpu.memory_space<vmem>>, %arg4: memref<1x4xf32, #tpu.memory_space<vmem>>, %arg5: memref<4x64xf32, #tpu.memory_space<vmem>>, %arg6: memref<1x64xf32, #tpu.memory_space<vmem>>, %arg7: memref<1x1x64xf32, #tpu.memory_space<vmem>>, %arg8: memref<1x64x128xf32, #tpu.memory_space<vmem>>, %arg9: memref<1x64x128xf32, #tpu.memory_space<vmem>>) attributes {dimension_semantics = [#tpu.dimension_semantics<parallel>, #tpu.dimension_semantics<arbitrary>], iteration_bounds = array<i64: 2, 4>, scalar_prefetch = 0 : i64, scratch_operands = 2 : i64, tpu.core_type = #tpu.core_type<tc>, window_params = [{transform_indices = @transform_0, window_bounds = array<i64: 1, 64, 512>}, {pipeline_mode = #tpu.pipeline_mode<synchronous>, transform_indices = @transform_1, window_bounds = array<i64: 64, 4>}, {pipeline_mode = #tpu.pipeline_mode<synchronous>, transform_indices = @transform_2, window_bounds = array<i64: 1, 4>}, {pipeline_mode = #tpu.pipeline_mode<synchronous>, transform_indices = @transform_3, window_bounds = array<i64: 4, 64>}, {pipeline_mode = #tpu.pipeline_mode<synchronous>, transform_indices = @transform_4, window_bounds = array<i64: 1, 64>}, {transform_indices = @transform_5, window_bounds = array<i64: 1, 1, 64>}]} {
    %c0_i32 = arith.constant 0 : i32
    %0 = arith.cmpi eq, %arg1, %c0_i32 : i32
    %1 = arith.extui %0 : i1 to i32
    %c0_i32_0 = arith.constant 0 : i32
    %2 = arith.cmpi ne, %1, %c0_i32_0 : i32
    scf.if %2 {
      %cst_29 = arith.constant 0.000000e+00 : f32
      %56 = vector.broadcast %cst_29 : f32 to vector<1x64x128xf32>
      %c0_30 = arith.constant 0 : index
      %c0_31 = arith.constant 0 : index
      %c0_32 = arith.constant 0 : index
      %57 = vector.load %arg8[%c0_30, %c0_31, %c0_32] : memref<1x64x128xf32, #tpu.memory_space<vmem>>, vector<1x64x128xf32>
      tpu.vector_store %arg8[%c0_30, %c0_31, %c0_32], %56 {strides = array<i32>} : memref<1x64x128xf32, #tpu.memory_space<vmem>>, vector<1x64x128xf32>,
      %cst_33 = arith.constant 0.000000e+00 : f32
      %58 = vector.broadcast %cst_33 : f32 to vector<1x64x128xf32>
      %c0_34 = arith.constant 0 : index
      %c0_35 = arith.constant 0 : index
      %c0_36 = arith.constant 0 : index
      %59 = vector.load %arg9[%c0_34, %c0_35, %c0_36] : memref<1x64x128xf32, #tpu.memory_space<vmem>>, vector<1x64x128xf32>
      tpu.vector_store %arg9[%c0_34, %c0_35, %c0_36], %58 {strides = array<i32>} : memref<1x64x128xf32, #tpu.memory_space<vmem>>, vector<1x64x128xf32>,
    } else {
    }
    %3 = tpu.iota {dimensions = array<i32: 2>} : vector<1x64x128xi32>
    %c512_i32 = arith.constant 512 : i32
    %4 = arith.muli %arg1, %c512_i32 : i32
    %c0 = arith.constant 0 : index
    %c0_1 = arith.constant 0 : index
    %c0_2 = arith.constant 0 : index
    %5 = vector.load %arg8[%c0, %c0_1, %c0_2] : memref<1x64x128xf32, #tpu.memory_space<vmem>>, vector<1x64x128xf32>
    %c0_3 = arith.constant 0 : index
    %c0_4 = arith.constant 0 : index
    %c0_5 = arith.constant 0 : index
    %6 = vector.load %arg9[%c0_3, %c0_4, %c0_5] : memref<1x64x128xf32, #tpu.memory_space<vmem>>, vector<1x64x128xf32>
    %c0_6 = arith.constant 0 : index
    %c0_7 = arith.constant 0 : index
    %c0_8 = arith.constant 0 : index
    %7 = vector.load %arg2[%c0_6, %c0_7, %c0_8] : memref<1x64x512xf32, #tpu.memory_space<vmem>>, vector<1x64x128xf32>
    %c0_i32_9 = arith.constant 0 : i32
    %8 = arith.addi %4, %c0_i32_9 : i32
    %9 = vector.broadcast %8 : i32 to vector<1x64x128xi32>
    %10 = arith.addi %9, %3 : vector<1x64x128xi32>
    %c1920_i32 = arith.constant 1920 : i32
    %11 = vector.broadcast %c1920_i32 : i32 to vector<1x64x128xi32>
    %12 = arith.cmpi slt, %10, %11 : vector<1x64x128xi32>
    %cst = arith.constant 0.000000e+00 : f32
    %13 = vector.broadcast %cst : f32 to vector<1x64x128xf32>
    %14 = arith.select %12, %7, %13 : vector<1x64x128xi1>, vector<1x64x128xf32>
    %15 = arith.addf %5, %14 : vector<1x64x128xf32>
    %16 = math.absf %14 : vector<1x64x128xf32>
    %17 = arith.addf %6, %16 : vector<1x64x128xf32>
    %c0_10 = arith.constant 0 : index
    %c0_11 = arith.constant 0 : index
    %c128 = arith.constant 128 : index
    %18 = vector.load %arg2[%c0_10, %c0_11, %c128] : memref<1x64x512xf32, #tpu.memory_space<vmem>>, vector<1x64x128xf32>
    %c128_i32 = arith.constant 128 : i32
    %19 = arith.addi %4, %c128_i32 : i32
    %20 = vector.broadcast %19 : i32 to vector<1x64x128xi32>
    %21 = arith.addi %20, %3 : vector<1x64x128xi32>
    %c1920_i32_12 = arith.constant 1920 : i32
    %22 = vector.broadcast %c1920_i32_12 : i32 to vector<1x64x128xi32>
    %23 = arith.cmpi slt, %21, %22 : vector<1x64x128xi32>
    %cst_13 = arith.constant 0.000000e+00 : f32
    %24 = vector.broadcast %cst_13 : f32 to vector<1x64x128xf32>
    %25 = arith.select %23, %18, %24 : vector<1x64x128xi1>, vector<1x64x128xf32>
    %26 = arith.addf %15, %25 : vector<1x64x128xf32>
    %27 = math.absf %25 : vector<1x64x128xf32>
    %28 = arith.addf %17, %27 : vector<1x64x128xf32>
    %c0_14 = arith.constant 0 : index
    %c0_15 = arith.constant 0 : index
    %c256 = arith.constant 256 : index
    %29 = vector.load %arg2[%c0_14, %c0_15, %c256] : memref<1x64x512xf32, #tpu.memory_space<vmem>>, vector<1x64x128xf32>
    %c256_i32 = arith.constant 256 : i32
    %30 = arith.addi %4, %c256_i32 : i32
    %31 = vector.broadcast %30 : i32 to vector<1x64x128xi32>
    %32 = arith.addi %31, %3 : vector<1x64x128xi32>
    %c1920_i32_16 = arith.constant 1920 : i32
    %33 = vector.broadcast %c1920_i32_16 : i32 to vector<1x64x128xi32>
    %34 = arith.cmpi slt, %32, %33 : vector<1x64x128xi32>
    %cst_17 = arith.constant 0.000000e+00 : f32
    %35 = vector.broadcast %cst_17 : f32 to vector<1x64x128xf32>
    %36 = arith.select %34, %29, %35 : vector<1x64x128xi1>, vector<1x64x128xf32>
    %37 = arith.addf %26, %36 : vector<1x64x128xf32>
    %38 = math.absf %36 : vector<1x64x128xf32>
    %39 = arith.addf %28, %38 : vector<1x64x128xf32>
    %c0_18 = arith.constant 0 : index
    %c0_19 = arith.constant 0 : index
    %c384 = arith.constant 384 : index
    %40 = vector.load %arg2[%c0_18, %c0_19, %c384] : memref<1x64x512xf32, #tpu.memory_space<vmem>>, vector<1x64x128xf32>
    %c384_i32 = arith.constant 384 : i32
    %41 = arith.addi %4, %c384_i32 : i32
    %42 = vector.broadcast %41 : i32 to vector<1x64x128xi32>
    %43 = arith.addi %42, %3 : vector<1x64x128xi32>
    %c1920_i32_20 = arith.constant 1920 : i32
    %44 = vector.broadcast %c1920_i32_20 : i32 to vector<1x64x128xi32>
    %45 = arith.cmpi slt, %43, %44 : vector<1x64x128xi32>
    %cst_21 = arith.constant 0.000000e+00 : f32
    %46 = vector.broadcast %cst_21 : f32 to vector<1x64x128xf32>
    %47 = arith.select %45, %40, %46 : vector<1x64x128xi1>, vector<1x64x128xf32>
    %48 = arith.addf %37, %47 : vector<1x64x128xf32>
    %49 = math.absf %47 : vector<1x64x128xf32>
    %50 = arith.addf %39, %49 : vector<1x64x128xf32>
    %c0_22 = arith.constant 0 : index
    %c0_23 = arith.constant 0 : index
    %c0_24 = arith.constant 0 : index
    %51 = vector.load %arg8[%c0_22, %c0_23, %c0_24] : memref<1x64x128xf32, #tpu.memory_space<vmem>>, vector<1x64x128xf32>
    tpu.vector_store %arg8[%c0_22, %c0_23, %c0_24], %48 {strides = array<i32>} : memref<1x64x128xf32, #tpu.memory_space<vmem>>, vector<1x64x128xf32>,
    %c0_25 = arith.constant 0 : index
    %c0_26 = arith.constant 0 : index
    %c0_27 = arith.constant 0 : index
    %52 = vector.load %arg9[%c0_25, %c0_26, %c0_27] : memref<1x64x128xf32, #tpu.memory_space<vmem>>, vector<1x64x128xf32>
    tpu.vector_store %arg9[%c0_25, %c0_26, %c0_27], %50 {strides = array<i32>} : memref<1x64x128xf32, #tpu.memory_space<vmem>>, vector<1x64x128xf32>,
    %c3_i32 = arith.constant 3 : i32
    %53 = arith.cmpi eq, %arg1, %c3_i32 : i32
    %54 = arith.extui %53 : i1 to i32
    %c0_i32_28 = arith.constant 0 : i32
    %55 = arith.cmpi ne, %54, %c0_i32_28 : i32
    scf.if %55 {
      %c0_29 = arith.constant 0 : index
      %c0_30 = arith.constant 0 : index
      %c0_31 = arith.constant 0 : index
      %56 = vector.load %arg8[%c0_29, %c0_30, %c0_31] : memref<1x64x128xf32, #tpu.memory_space<vmem>>, vector<1x64x128xf32>
      %cst_32 = arith.constant dense<0.000000e+00> : vector<1x64xf32>
      %57 = vector.multi_reduction <add>, %56, %cst_32 [2] : vector<1x64x128xf32> to vector<1x64xf32>
      %cst_33 = arith.constant 5.2083336E-4 : f32
      %58 = vector.broadcast %cst_33 : f32 to vector<1x64xf32>
      %59 = arith.mulf %57, %58 : vector<1x64xf32>
      %c0_34 = arith.constant 0 : index
      %c0_35 = arith.constant 0 : index
      %c0_36 = arith.constant 0 : index
      %60 = vector.load %arg9[%c0_34, %c0_35, %c0_36] : memref<1x64x128xf32, #tpu.memory_space<vmem>>, vector<1x64x128xf32>
      %cst_37 = arith.constant dense<0.000000e+00> : vector<1x64xf32>
      %61 = vector.multi_reduction <add>, %60, %cst_37 [2] : vector<1x64x128xf32> to vector<1x64xf32>
      %cst_38 = arith.constant 5.2083336E-4 : f32
      %62 = vector.broadcast %cst_38 : f32 to vector<1x64xf32>
      %63 = arith.mulf %61, %62 : vector<1x64xf32>
      %c0_39 = arith.constant 0 : index
      %c0_40 = arith.constant 0 : index
      %64 = vector.load %arg3[%c0_39, %c0_40] : memref<64x4xf32, #tpu.memory_space<vmem>>, vector<64x4xf32>
      %cst_41 = arith.constant dense<0.000000e+00> : vector<1x4xf32>
      %65 = tpu.matmul %59, %64, %cst_41 {dimension_numbers = #tpu.dot_dimension_numbers<[1], [0], [0], [1], [0, 0, 1, 1], [], []>} : vector<1x64xf32>, vector<64x4xf32>, vector<1x4xf32> -> vector<1x4xf32>
      %c0_42 = arith.constant 0 : index
      %c0_43 = arith.constant 0 : index
      %66 = vector.load %arg4[%c0_42, %c0_43] : memref<1x4xf32, #tpu.memory_space<vmem>>, vector<1x4xf32>
      %67 = arith.addf %65, %66 : vector<1x4xf32>
      %cst_44 = arith.constant 0.000000e+00 : f32
      %68 = vector.broadcast %cst_44 : f32 to vector<1x4xf32>
      %69 = arith.maximumf %67, %68 : vector<1x4xf32>
      %c0_45 = arith.constant 0 : index
      %c0_46 = arith.constant 0 : index
      %70 = vector.load %arg5[%c0_45, %c0_46] : memref<4x64xf32, #tpu.memory_space<vmem>>, vector<4x64xf32>
      %cst_47 = arith.constant dense<0.000000e+00> : vector<1x64xf32>
      %71 = tpu.matmul %69, %70, %cst_47 {dimension_numbers = #tpu.dot_dimension_numbers<[1], [0], [0], [1], [0, 0, 1, 1], [], []>} : vector<1x4xf32>, vector<4x64xf32>, vector<1x64xf32> -> vector<1x64xf32>
      %c0_48 = arith.constant 0 : index
      %c0_49 = arith.constant 0 : index
      %72 = vector.load %arg6[%c0_48, %c0_49] : memref<1x64xf32, #tpu.memory_space<vmem>>, vector<1x64xf32>
      %73 = arith.addf %71, %72 : vector<1x64xf32>
      %74 = arith.negf %73 : vector<1x64xf32>
      %75 = math.exp %74 : vector<1x64xf32>
      %cst_50 = arith.constant 1.000000e+00 : f32
      %76 = vector.broadcast %cst_50 : f32 to vector<1x64xf32>
      %77 = arith.addf %76, %75 : vector<1x64xf32>
      %78 = arith.divf %76, %77 : vector<1x64xf32>
      %79 = arith.mulf %78, %63 : vector<1x64xf32>
      %80 = vector.shape_cast %79 : vector<1x64xf32> to vector<1x1x64xf32>
      %c0_51 = arith.constant 0 : index
      %c0_52 = arith.constant 0 : index
      %c0_53 = arith.constant 0 : index
      %81 = vector.load %arg7[%c0_51, %c0_52, %c0_53] : memref<1x1x64xf32, #tpu.memory_space<vmem>>, vector<1x1x64xf32>
      tpu.vector_store %arg7[%c0_51, %c0_52, %c0_53], %80 {strides = array<i32>} : memref<1x1x64xf32, #tpu.memory_space<vmem>>, vector<1x1x64xf32>,
    } else {
    }
    return
  }
  func.func @transform_0(%arg0: i32, %arg1: i32) -> (i32, i32, i32) {
    %c0_i32 = arith.constant 0 : i32
    %c0_i32_0 = arith.constant 0 : i32
    return %arg0, %c0_i32, %arg1 : i32, i32, i32
  }
  func.func @transform_1(%arg0: i32, %arg1: i32) -> (i32, i32) {
    %c0_i32 = arith.constant 0 : i32
    %c0_i32_0 = arith.constant 0 : i32
    %c0_i32_1 = arith.constant 0 : i32
    return %c0_i32, %c0_i32_0 : i32, i32
  }
  func.func @transform_2(%arg0: i32, %arg1: i32) -> (i32, i32) {
    %c0_i32 = arith.constant 0 : i32
    %c0_i32_0 = arith.constant 0 : i32
    %c0_i32_1 = arith.constant 0 : i32
    return %c0_i32, %c0_i32_0 : i32, i32
  }
  func.func @transform_3(%arg0: i32, %arg1: i32) -> (i32, i32) {
    %c0_i32 = arith.constant 0 : i32
    %c0_i32_0 = arith.constant 0 : i32
    %c0_i32_1 = arith.constant 0 : i32
    return %c0_i32, %c0_i32_0 : i32, i32
  }
  func.func @transform_4(%arg0: i32, %arg1: i32) -> (i32, i32) {
    %c0_i32 = arith.constant 0 : i32
    %c0_i32_0 = arith.constant 0 : i32
    %c0_i32_1 = arith.constant 0 : i32
    return %c0_i32, %c0_i32_0 : i32, i32
  }
  func.func @transform_5(%arg0: i32, %arg1: i32) -> (i32, i32, i32) {
    %c0_i32 = arith.constant 0 : i32
    %c0_i32_0 = arith.constant 0 : i32
    %c0_i32_1 = arith.constant 0 : i32
    return %arg0, %c0_i32, %c0_i32_0 : i32, i32, i32
  }
}

</mosaic_0001>

<bundles_post_ra>
// kernel: tile.18
= control target key start
LH: loop header
LB: loop body
LE: loop exit
PB: predicated region body
PF: predicated region fallthrough
CT: control target
= control target key end

     0   :  { %s22_s0 = inlined_call_operand.vmem [shape: f32[16], index: 0, kind: input, shape index: {}]   ;;  %s23_s1 = inlined_call_operand.vmem [shape: f32[4,16], index: 1, kind: output, shape index: {}]  }
   0x1   :  { %v4_v0 = vld [vmem:[%s22_s0] ss:$0 sm:$0xff] }
   0x2   :  { %5 = vst [vmem:[%s23_s1] sm:$0xf] %v4_v0 }

// kernel: tile.19
= control target key start
LH: loop header
LB: loop body
LE: loop exit
PB: predicated region body
PF: predicated region fallthrough
CT: control target
= control target key end

     0   :  { %s37_s8 = smov 16   ;;  %s38_s9 = smov 32   ;;  %vm7_vm0 = vcmask 130048   ;;  %vm13_vm1 = vcmask 523648   ;;  %vm19_vm2 = vcmask 392448   ;;  %vm25_vm3 = vcmask 261248   ;;  %s55_s0 = inlined_call_operand.vmem [shape: f32[4,16], index: 0, kind: input, shape index: {}]   ;;  %s56_s1 = inlined_call_operand.vmem [shape: f32[1,64], index: 1, kind: output, shape index: {}]  }
   0x1   :  { %v4_v0 = vld [vmem:[%s55_s0] sm:$0xf]  ;;  %s36_s0 = smov 48  }
   0x2   :  { %5 = vst [vmem:[#allocation1] sm:$0xf] %v4_v0 }
   0x9   :  { %v10_v1 = vld [vmem:[#allocation1 + $0x3] sm:$0x1]   ;;  %v22_v2 = vld [vmem:[#allocation1 + $0x1] sm:$0x1]   ;;  %v16_v3 = vld [vmem:[#allocation1 + $0x2] sm:$0x1]  }
   0xa   :  { %11 = vrot.lane.b32.xlu0 %v10_v1, %s36_s0  ;;  %23 = vrot.lane.b32.xlu1 %v22_v2, %s37_s8  ;;  %v6_v4 = vld [vmem:[#allocation1] sm:$0x1]  }
   0xb   :  { %8 = vst.msk [vmem:[#allocation0] sm:$0x1] %vm7_vm0, %v6_v4  }
  0x12   :  { %17 = vrot.lane.b32.xlu0 %v16_v3, %s38_s9 }
  0x7c   :  { %v12_v5 = vpop.permute.xlu0 %11   ;;  %v24_v6 = vpop.permute.xlu1 %23  }
  0x7d   :  { %14 = vst.msk [vmem:[#allocation0] sm:$0x1] %vm13_vm1, %v12_v5  }
  0x84   :  { %v18_v7 = vpop.permute.xlu0 %17  }
  0x85   :  { %20 = vst.msk [vmem:[#allocation0] sm:$0x1] %vm19_vm2, %v18_v7  }
  0x86   :  { %26 = vst.msk [vmem:[#allocation0] sm:$0x1] %vm25_vm3, %v24_v6  }
  0x8d   :  { %v29_v8 = vld [vmem:[#allocation0] sm:$0x1] }
  0x8e   :  { %32 = vst [vmem:[%s56_s1] sm:$0x1] %v29_v8 }

// kernel: tile.14
= control target key start
LH: loop header
LB: loop body
LE: loop exit
PB: predicated region body
PF: predicated region fallthrough
CT: control target
= control target key end

     0   :  { %s52_s14 = smov 16   ;;  %s53_s15 = smov 32   ;;  %vm19_vm0 = vcmask 130048   ;;  %vm25_vm1 = vcmask 523648   ;;  %vm31_vm2 = vcmask 392448   ;;  %vm37_vm3 = vcmask 261248   ;;  %s79_s0 = inlined_call_operand.vmem [shape: f32[4,4,16], index: 0, kind: input, shape index: {}]   ;;  %s80_s1 = inlined_call_operand.vmem [shape: f32[4,64], index: 1, kind: output, shape index: {}]  }
   0x1   :  { %v45_v0 = vld [vmem:[%s79_s0 + $0xc] sm:$0xf]  ;;  %v46_v1 = vld [vmem:[%s79_s0 + $0x8] sm:$0xf]  ;;  %v47_v2 = vld [vmem:[%s79_s0 + $0x4] sm:$0xf] }
   0x2   :  { %7 = vst [vmem:[#allocation1 + $0x18] sm:$0xf] %v45_v0  ;;  %v16_v3 = vld [vmem:[%s79_s0] sm:$0xf]  ;;  %s51_s0 = smov 48  }
   0x3   :  { %11 = vst [vmem:[#allocation1 + $0x10] sm:$0xf] %v46_v1 }
   0x4   :  { %15 = vst [vmem:[#allocation1 + $0x8] sm:$0xf] %v47_v2 }
   0x5   :  { %17 = vst [vmem:[#allocation1] sm:$0xf] %v16_v3 }
   0xc   :  { %v22_v4 = vld [vmem:[#allocation1 + $0x3] ss:$8 sm:$0xf]   ;;  %v34_v5 = vld [vmem:[#allocation1 + $0x1] ss:$8 sm:$0xf]  }
   0xd   :  { %23 = vrot.lane.b32.xlu0 %v22_v4, %s51_s0  ;;  %35 = vrot.lane.b32.xlu1 %v34_v5, %s52_s14  ;;  %v28_v6 = vld [vmem:[#allocation1 + $0x2] ss:$8 sm:$0xf]   ;;  %v18_v7 = vld [vmem:[#allocation1] ss:$8 sm:$0xf]  }
   0xe   :  { %20 = vst.msk [vmem:[#allocation0] sm:$0xf] %vm19_vm0, %v18_v7  }
  0x15   :  { %29 = vrot.lane.b32.xlu0 %v28_v6, %s53_s15 }
  0x7f   :  { %v24_v8 = vpop.permute.xlu0 %23   ;;  %v36_v9 = vpop.permute.xlu1 %35  }
  0x80   :  { %26 = vst.msk [vmem:[#allocation0] sm:$0xf] %vm25_vm1, %v24_v8  }
  0x87   :  { %v30_v10 = vpop.permute.xlu0 %29  }
  0x88   :  { %32 = vst.msk [vmem:[#allocation0] sm:$0xf] %vm31_vm2, %v30_v10  }
  0x89   :  { %38 = vst.msk [vmem:[#allocation0] sm:$0xf] %vm37_vm3, %v36_v9  }
  0x90   :  { %v41_v11 = vld [vmem:[#allocation0] sm:$0xf] }
  0x91   :  { %44 = vst [vmem:[%s80_s1] sm:$0xf] %v41_v11 }

// kernel: shared_threshold.1
= control target key start
LH: loop header
LB: loop body
LE: loop exit
PB: predicated region body
PF: predicated region fallthrough
CT: control target
= control target key end

     0   :  { %10 = vsyncpa [#allocation5], 0  ;;  %s1658_s0 = inlined_call_operand.hbm [shape: f32[2,64,1920], index: 0, kind: input, shape index: {}]   ;;  %s1659_s1 = inlined_call_operand.vmem [shape: f32[64,4], index: 1, kind: input, shape index: {}]   ;;  %s1660_s2 = inlined_call_operand.vmem [shape: f32[1,4], index: 2, kind: input, shape index: {}]   ;;  %s1661_s3 = inlined_call_operand.vmem [shape: f32[4,64], index: 3, kind: input, shape index: {}]   ;;  %s1662_s4 = inlined_call_operand.vmem [shape: f32[1,64], index: 4, kind: input, shape index: {}]   ;;  %s1663_s5 = inlined_call_operand.hbm [shape: f32[2,1,64], index: 5, kind: output, shape index: {}]  }
   0x1   :  { %12 = vsyncpa [#allocation5 + $0x1], 0 }
   0x2   :  { %13 = vsyncpa [#allocation6], 0 }
   0x3   :  { %15 = vsyncpa [#allocation6 + $0x1], 0  ;;  %s1136_s18 = smov 0   ;;  %s1138_s19 = smov 0  }
   0x4   :  { %s1140_s20 = smov 0   ;;  %s1142_s21 = smov 0  }
   0x5   :  { %s1144_s22 = smov 0   ;;  %s1146_s23 = smov 0  }
   0x6   :  { %s1148_s24 = smov 0   ;;  %s1150_s25 = smov 0  }
   0x7   :  { %s1152_s26 = smov 0   ;;  %s1154_s27 = smov 0  }
   0x8   :  { %s1156_s28 = smov 0  }
   0x9 LB: > { %1674 = sst [smem:[#allocation10_spill]] %s1060_s18  ;;  %s810_s29 = sadd.s32 4294967295, %s1100_s28   ;;  %s1100_s28 = sphi %s1156_s28, %s21_s28   ;;  %s1096_s27 = sphi %s1154_s27, %s1700_s27   ;;  %s1092_s26 = sphi %s1152_s26, %s1699_s26   ;;  %s1088_s25 = sphi %s1150_s25, %s1698_s25   ;;  %s1084_s24 = sphi %s1148_s24, %s1697_s24   ;;  %s1080_s23 = sphi %s1146_s23, %s1696_s23   ;;  %s1076_s22 = sphi %s1144_s22, %s1704_s22   ;;  %s1072_s21 = sphi %s1142_s21, %s1703_s21   ;;  %s1068_s20 = sphi %s1140_s20, %s1694_s20   ;;  %s1064_s19 = sphi %s1138_s19, %s1702_s19   ;;  %s1060_s18 = sphi %s1136_s18, %s1701_s18  }
   0xa   : > { %1675 = sst [smem:[#allocation11_spill]] %s1068_s20  ;;  %s811_s30 = sadd.s32 4294967294, %s1100_s28  }
   0xb   : > { %1676 = sst [smem:[#allocation12_spill]] %s1080_s23  ;;  %s30_s6 = sadd.s32 1, %s1092_s26 }
   0xc   : > { %1677 = sst [smem:[#allocation13_spill]] %s1092_s26  ;;  %s33_s7 = sadd.s32 1, %s1096_s27 }
   0xd   : > { %1678 = sst [smem:[#allocation14_spill]] %s1096_s27  ;;  %p31_p0 = scmp.ge.s32.totalorder %s30_s6, 4 }
   0xe   : > { %s42_s8 = sadd.s32 1, %s1080_s23  ;;  %p49_p1 = scmp.ne.s32.totalorder %s1080_s23, %s1076_s22 }
   0xf   : > { %p50_p2 = scmp.eq.s32.totalorder %s1100_s28, 0  ;;  %s1706_s6 = smov (%p31_p0, %s30_s6), 0 }
  0x10   : > { %1679 = sst [smem:[#allocation15_spill]] %s1706_s6  ;;  %s1708_s7 = smov (!%p31_p0, %s33_s7), %s1096_s27 }
  0x11   : > { %s38_s9 = ssub.s32 %s1092_s26, %s1706_s6  ;;  %p1202_p3 = por %p50_p2, %p49_p1 }
  0x12   : > { %p35_p4 = scmp.ge.s32.totalorder %s1708_s7, 2  ;;  %p55_p5 = scmp.ne.s32.totalorder %s1076_s22, %s1072_s21 }
  0x13   : > { %p56_p6 = scmp.eq.s32.totalorder %s810_s29, 0  ;;  %s152_s11 = sadd.s32 1, %s1068_s20 }
  0x14   : > { %s1710_s7 = smov (%p35_p4, %s1708_s7), 0  ;;  %p162_p8 = scmp.ne.s32.totalorder %s1068_s20, %s1064_s19 }
  0x15   : > { %1681 = sst [smem:[#allocation16_spill]] %s1710_s7  ;;  %p1210_p7 = por %p56_p6, %p55_p5 }
  0x16   : > { %s37_s13 = ssub.s32 %s1096_s27, %s1710_s7  ;;  %p163_p9 = scmp.eq.s32.totalorder %s810_s29, 7 }
  0x17   : > { %s39_s14 = sor.u32 %s38_s9, %s37_s13  ;;  %p150_p10 = scmp.eq.s32.totalorder %s37_s13, 0 }
  0x18   : > { %p40_p11 = scmp.eq.s32.totalorder %s39_s14, 0  ;;  %p1218_p12 = por %p163_p9, %p162_p8 }
  0x19   : > { %s1223_s16 = scalar_select %p150_p10, %s1068_s20, %s152_s11  }
  0x1a   : > { %s1683_s15 = scalar_select %p1218_p12, 1, 0 }
  0x1b   : > { %1685 = sst [smem:[#allocation18_spill]] %s1223_s16  ;;  %p168_p13 = scmp.ne.s32.totalorder %s1064_s19, %s1060_s18 }
  0x1c   : > { %1684 = sst [smem:[#allocation17_spill]] %s1683_s15  ;;  %p169_p0 = scmp.eq.s32.totalorder %s811_s30, 7 }
  0x1d   : > { %s1226_s17 = scalar_select %p40_p11, %s1080_s23, %s42_s8  }
  0x1e   : > { %p1230_p1 = por %p169_p0, %p168_p13  ;;  %p813_p2 = scmp.ge.s32.totalorder %s1100_s28, 8 }
  0x1f   : > { %1686 = sst [smem:[#allocation19_spill]] %s1226_s17 }
  0x20   : > { %s1687_s21 = scalar_select %p1230_p1, 1, 0 }
  0x21   : > { %197 = sbr.rel (%p813_p2) target bundleno = 64 (0x40), region = 32 }
  0x22   : > { %1688 = sst [smem:[#allocation20_spill]] %s1687_s21 }
  0x26   : > { %200 = sbr.rel (!%p1202_p3) target bundleno = 64 (0x40), region = 36  ;;  %s201_s29 = sand.u32 (%p1202_p3), 1, %s1080_s23  }
  0x27   : > { %s815_s9 = sshll.u32 (%p1202_p3), %s1092_s26, 2  ;;  %s814_s11 = sshll.u32 (%p1202_p3), %s201_s29, 8 }
  0x28   : > { %s207_s13 = ssub.s32 (%p1202_p3), 15, %s815_s9  ;;  %s1242_s7 = scalar_lea.sflag (%p1202_p3), [#allocation5], %s201_s29 }
  0x29   : > { %p208_p4 = scmp.lt.s32.totalorder (%p1202_p3), %s207_s13, 4  ;;  %s205_s6 = scalar_lea.vmem (%p1202_p3), [#allocation4], %s814_s11 }
  0x2b   : > { %s1712_s13 = smov (!%p208_p4, %s207_s13), 4 }
  0x2c   : > { %s816_s30 = sshll.u32 %s1712_s13, 6 }
  0x2d   : > { %s211_s8 = ssub.s32 256, %s816_s30 }
  0x2e   : > { %s212_s14 = sshll.u32 %s211_s8, 4 }
  0x2f   : > { %213 = vsyncadd %s1242_s7, %s212_s14  ;;  %p1245_p3 = scmp.ne.s32.totalorder %s816_s30, 0  ;;  %s835_s26 = smul.u32 120, %s1096_s27 }
  0x30   : > { %s819_s17 = sshll.u32 %s1712_s13, 3  ;;  %s223_s23 = sshll.u32 %s205_s6, 4  ;;  %s224_s23 = int_to_ptr.vmem [resolvable:$true] %s223_s23 }
  0x31   : > { %s216_s16 = sadd.s32 %s835_s26, %s815_s9  ;;  %s834_s8 = sshll.u32 %s1712_s13, 10 }
  0x32   : > { %s818_s20 = sshll.u32 %s216_s16, 3  ;;  %s941_s18 = sshrl.u32 %s834_s8, 4 }
  0x33   : > { %s218_s11 = scalar_lea.hbm %s1658_s0, %s818_s20  ;;  %s958_s15 = sshra.s32 %s224_s23, 4  ;;  %s959_s15 = int_to_ptr.vmem [resolvable:$true] %s958_s15 }
  0x34   : > { %s221_s14 = sshll.u32 %s218_s11, 4  ;;  %s965_s30 = scalar_lea.vmem %s959_s15, %s941_s18  ;;  %s222_s14 = int_to_ptr.hbm [resolvable:$true] %s221_s14 }
  0x35   : > { %p966_p5 = scmp.ne.s32.totalorder %s959_s15, %s965_s30  ;;  %s1102_s27 = smov [#allocation4]  }
  0x36   : > { %s969_s6 = scalar_lea.vmem %s1102_s27, 512 }
  0x37   : > { %p967_p6 = pnand %p966_p5, %p1245_p3  ;;  %p971_p9 = scmp.lt.s32.totalorder %s969_s6, %s965_s30 }
  0x39   : > { %p968_p8 = pneg %p967_p6 }
  0x3b   : > { %p973_p10 = pnand %p971_p9, %p968_p8 }
  0x3d   : > { %976 = shalt.err (!%p973_p10)
}
  0x3e   : > { %s1103_s26 = smov 1920   ;;  %s1104_s16 = smov 512  }
  0x3f   : > { %229 = dma.hbm_to_vmem [thread:$0]  (%p1245_p3), %s222_s14, %s834_s8, %s224_s23, %s1242_s7, %s1103_s26, %s1104_s16, %s819_s17  }
  0x40 PF: > { %p822_p11 = scmp.ge.s32.totalorder %s1100_s28, 1  ;;  %p231_p13 = scmp.lt.s32.totalorder %s1100_s28, 9 }
  0x42   : > { %p232_p0 = pnand %p822_p11, %p231_p13 }
  0x43   : > { %s237_s18 = sand.u32 (!%p232_p0), 1, %s1076_s22  }
  0x44   : > { %235 = sbr.rel (%p232_p0) target bundleno = 587 (0x24b), region = 40  ;;  %s823_s20 = sshll.u32 (!%p232_p0), %s237_s18, 8 }
  0x45   : > { %s238_s27 = scalar_lea.sflag (!%p232_p0), [#allocation5], %s237_s18  ;;  %s1263_s15 = scalar_lea.vmem (!%p232_p0), [#allocation4], %s823_s20 }
  0x49   : > { %1051 = dma.done.wait (%p1210_p7), %s238_s27, 4096  }
  0x4a   : > { %1053 = vsyncadd (%p1210_p7), %s238_s27, 4294963200  ;;  %s266_s23 = sand.u32 1, %s1064_s19   ;;  %p824_p2 = scmp.ne.s32.totalorder %s1084_s24, 0 }
  0x4b   : > { %s1272_s7 = scalar_lea.vmem [#allocation7], %s266_s23 }
  0x4c   : > { %276 = sbr.rel (%p824_p2) target bundleno = 98 (0x62), region = 48 }
  0x51   : > { %v1105_v0 = vmov 0.0  }
  0x52   : > { %277 = vst [vmem:[#allocation2 + $0x30] sm:$0xff] %v1105_v0 }
  0x53   : > { %278 = vst [vmem:[#allocation2] sm:$0xff] %v1105_v0 }
  0x54   : > { %279 = vst [vmem:[#allocation2 + $0x18] sm:$0xff] %v1105_v0 }
  0x55   : > { %280 = vst [vmem:[#allocation2 + $0x10] sm:$0xff] %v1105_v0 }
  0x56   : > { %281 = vst [vmem:[#allocation2 + $0x8] sm:$0xff] %v1105_v0 }
  0x57   : > { %282 = vst [vmem:[#allocation2 + $0x20] sm:$0xff] %v1105_v0 }
  0x58   : > { %283 = vst [vmem:[#allocation2 + $0x28] sm:$0xff] %v1105_v0 }
  0x59   : > { %284 = vst [vmem:[#allocation2 + $0x38] sm:$0xff] %v1105_v0 }
  0x5a   : > { %285 = vst [vmem:[#allocation3] sm:$0xff] %v1105_v0 }
  0x5b   : > { %286 = vst [vmem:[#allocation3 + $0x18] sm:$0xff] %v1105_v0 }
  0x5c   : > { %287 = vst [vmem:[#allocation3 + $0x10] sm:$0xff] %v1105_v0 }
  0x5d   : > { %288 = vst [vmem:[#allocation3 + $0x20] sm:$0xff] %v1105_v0 }
  0x5e   : > { %289 = vst [vmem:[#allocation3 + $0x28] sm:$0xff] %v1105_v0 }
  0x5f   : > { %290 = vst [vmem:[#allocation3 + $0x8] sm:$0xff] %v1105_v0 }
  0x60   : > { %291 = vst [vmem:[#allocation3 + $0x30] sm:$0xff] %v1105_v0 }
  0x61   : > { %292 = vst [vmem:[#allocation3 + $0x38] sm:$0xff] %v1105_v0 }
  0x62 PF: > { %v293_v1 = vlaneseq  ;;  %s825_s12 = sshll.u32 %s1084_s24, 9  ;;  %v312_v4 = vld [vmem:[%s1263_s15] sm:$0xff]  ;;  %v296_v7 = vld [vmem:[#allocation2 + $0x30] sm:$0xff]  ;;  %v355_v8 = vld [vmem:[%s1263_s15 + $0x8] sm:$0xff]  ;;  %p826_p7 = scmp.ne.s32.totalorder %s1084_s24, 3 }
  0x63   : > { %v320_v2 = vstv %s825_s12  ;;  %s363_s17 = sadd.s32 128, %s825_s12  ;;  %s407_s21 = sadd.s32 256, %s825_s12  ;;  %v399_v9 = vld [vmem:[%s1263_s15 + $0x10] sm:$0xff]  ;;  %v443_v10 = vld [vmem:[%s1263_s15 + $0x18] sm:$0xff]  ;;  %v297_v16 = vld [vmem:[#allocation2] sm:$0xff] }
  0x64   : > { %v1276_v3 = vand.u32 127, %v293_v1  ;;  %v364_v5 = vstv %s363_s17  ;;  %v408_v6 = vstv %s407_s21  ;;  %s451_s9 = sadd.s32 384, %s825_s12  ;;  %v313_v17 = vld [vmem:[%s1263_s15 + $0x20] sm:$0xff]  ;;  %v356_v18 = vld [vmem:[%s1263_s15 + $0x28] sm:$0xff]  ;;  %v298_v21 = vld [vmem:[#allocation2 + $0x18] sm:$0xff] }
  0x65   : > { %v452_v11 = vstv %s451_s9  ;;  %v400_v19 = vld [vmem:[%s1263_s15 + $0x30] sm:$0xff]  ;;  %v444_v20 = vld [vmem:[%s1263_s15 + $0x38] sm:$0xff]  ;;  %v314_v22 = vld [vmem:[%s1263_s15 + $0x40] sm:$0xff] }
  0x66   : > { %v1283_v12 = vadd.s32 %v320_v2, %v1276_v3  ;;  %v1286_v13 = vadd.s32 %v364_v5, %v1276_v3  ;;  %v1289_v14 = vadd.s32 %v408_v6, %v1276_v3  ;;  %v1292_v15 = vadd.s32 %v452_v11, %v1276_v3  ;;  %v357_v23 = vld [vmem:[%s1263_s15 + $0x48] sm:$0xff]  ;;  %v401_v28 = vld [vmem:[%s1263_s15 + $0x50] sm:$0xff]  ;;  %v445_v29 = vld [vmem:[%s1263_s15 + $0x58] sm:$0xff] }
  0x67   : > { %v315_v34 = vld [vmem:[%s1263_s15 + $0x60] sm:$0xff]  ;;  %v358_v35 = vld [vmem:[%s1263_s15 + $0x68] sm:$0xff]  ;;  %v402_v36 = vld [vmem:[%s1263_s15 + $0x70] sm:$0xff] }
  0x68   : > { %vm322_vm0 = vcmp.lt.s32.totalorder %v1283_v12, 1920  ;;  %vm366_vm1 = vcmp.lt.s32.totalorder %v1286_v13, 1920  ;;  %vm410_vm2 = vcmp.lt.s32.totalorder %v1289_v14, 1920  ;;  %vm454_vm3 = vcmp.lt.s32.totalorder %v1292_v15, 1920  ;;  %v299_v41 = vld [vmem:[#allocation2 + $0x10] sm:$0xff]  ;;  %v446_v42 = vld [vmem:[%s1263_s15 + $0x78] sm:$0xff] }
  0x69   : > { %v1306_v24 = vsel %vm322_vm0, %v312_v4, 0.0  ;;  %v1310_v25 = vsel %vm366_vm1, %v355_v8, 0.0  ;;  %v1314_v26 = vsel %vm410_vm2, %v399_v9, 0.0  ;;  %v1318_v27 = vsel %vm454_vm3, %v443_v10, 0.0  ;;  %v316_v47 = vld [vmem:[%s1263_s15 + $0x80] sm:$0xff]  ;;  %v359_v48 = vld [vmem:[%s1263_s15 + $0x88] sm:$0xff] }
  0x6a   : > { %v331_v30 = vadd.f32 %v1306_v24, %v296_v7  ;;  %v1325_v31 = vsel %vm322_vm0, %v313_v17, 0.0  ;;  %v1329_v32 = vsel %vm366_vm1, %v356_v18, 0.0  ;;  %v1333_v33 = vsel %vm410_vm2, %v400_v19, 0.0  ;;  %v403_v49 = vld [vmem:[%s1263_s15 + $0x90] sm:$0xff]  ;;  %v300_v54 = vld [vmem:[#allocation2 + $0x8] sm:$0xff]  ;;  %v447_v59 = vld [vmem:[%s1263_s15 + $0x98] sm:$0xff] }
  0x6b   : > { %v332_v37 = vadd.f32 %v1325_v31, %v297_v16  ;;  %v1341_v38 = vsel %vm454_vm3, %v444_v20, 0.0  ;;  %v1345_v39 = vsel %vm322_vm0, %v314_v22, 0.0  ;;  %v1349_v40 = vsel %vm366_vm1, %v357_v23, 0.0  ;;  %v317_v60 = vld [vmem:[%s1263_s15 + $0xa0] sm:$0xff]  ;;  %v360_v61 = vld [vmem:[%s1263_s15 + $0xa8] sm:$0xff]  ;;  %v404_v4 = vld [vmem:[%s1263_s15 + $0xb0] sm:$0xff] }
  0x6c   : > { %v375_v43 = vadd.f32 %v1310_v25, %v331_v30  ;;  %v333_v44 = vadd.f32 %v1345_v39, %v298_v21  ;;  %v1356_v45 = vsel %vm410_vm2, %v401_v28, 0.0  ;;  %v1360_v46 = vsel %vm454_vm3, %v445_v29, 0.0  ;;  %v301_v2 = vld [vmem:[#allocation2 + $0x20] sm:$0xff]  ;;  %v448_v9 = vld [vmem:[%s1263_s15 + $0xb8] sm:$0xff]  ;;  %v361_v11 = vld [vmem:[%s1263_s15 + $0xc8] sm:$0xff] }
  0x6d   : > { %v376_v50 = vadd.f32 %v1329_v32, %v332_v37  ;;  %v1368_v51 = vsel %vm322_vm0, %v315_v34, 0.0  ;;  %v1372_v52 = vsel %vm366_vm1, %v358_v35, 0.0  ;;  %v1376_v53 = vsel %vm410_vm2, %v402_v36, 0.0  ;;  %v318_v10 = vld [vmem:[%s1263_s15 + $0xc0] sm:$0xff]  ;;  %v302_v20 = vld [vmem:[#allocation2 + $0x28] sm:$0xff]  ;;  %v405_v21 = vld [vmem:[%s1263_s15 + $0xd0] sm:$0xff] }
  0x6e   : > { %v419_v55 = vadd.f32 %v1314_v26, %v375_v43  ;;  %v377_v56 = vadd.f32 %v1349_v40, %v333_v44  ;;  %v334_v57 = vadd.f32 %v1368_v51, %v299_v41  ;;  %v1383_v58 = vsel %vm454_vm3, %v446_v42, 0.0  ;;  %v449_v30 = vld [vmem:[%s1263_s15 + $0xd8] sm:$0xff]  ;;  %v319_v34 = vld [vmem:[%s1263_s15 + $0xe0] sm:$0xff]  ;;  %v362_v35 = vld [vmem:[%s1263_s15 + $0xe8] sm:$0xff] }
  0x6f   : > { %v420_v62 = vadd.f32 %v1333_v33, %v376_v50  ;;  %v1391_v63 = vsel %vm322_vm0, %v316_v47, 0.0  ;;  %v1395_v0 = vsel %vm366_vm1, %v359_v48, 0.0  ;;  %v1399_v1 = vsel %vm410_vm2, %v403_v49, 0.0  ;;  %v303_v43 = vld [vmem:[#allocation2 + $0x38] sm:$0xff]  ;;  %v406_v50 = vld [vmem:[%s1263_s15 + $0xf0] sm:$0xff] }
  0x70   : > { %v463_v5 = vadd.f32 %v1318_v27, %v419_v55  ;;  %v421_v6 = vadd.f32 %v1356_v45, %v377_v56  ;;  %v378_v7 = vadd.f32 %v1372_v52, %v334_v57  ;;  %v335_v8 = vadd.f32 %v1391_v63, %v300_v54  ;;  %v450_v54 = vld [vmem:[%s1263_s15 + $0xf8] sm:$0xff] }
  0x71   : > { %v464_v16 = vadd.f32 %v1341_v38, %v420_v62  ;;  %v1412_v17 = vsel %vm454_vm3, %v447_v59, 0.0  ;;  %v1416_v18 = vsel %vm322_vm0, %v317_v60, 0.0  ;;  %v1420_v19 = vsel %vm366_vm1, %v360_v61, 0.0  ;;  %v305_v14 = vld [vmem:[#allocation3 + $0x18] sm:$0xff] }
  0x72   : > { %487 = vst [vmem:[#allocation2 + $0x30] sm:$0xff] %v463_v5  ;;  %v465_v22 = vadd.f32 %v1360_v46, %v421_v6  ;;  %v422_v23 = vadd.f32 %v1376_v53, %v378_v7  ;;  %v379_v28 = vadd.f32 %v1395_v0, %v335_v8  ;;  %v336_v29 = vadd.f32 %v1416_v18, %v301_v2 }
  0x73   : > { %488 = vst [vmem:[#allocation2] sm:$0xff] %v464_v16  ;;  %v1432_v36 = vsel %vm410_vm2, %v404_v4, 0.0  ;;  %v1436_v37 = vsel %vm454_vm3, %v448_v9, 0.0  ;;  %v1440_v41 = vsel %vm322_vm0, %v318_v10, 0.0  ;;  %v1444_v42 = vsel %vm366_vm1, %v361_v11, 0.0  ;;  %v304_v4 = vld [vmem:[#allocation3] sm:$0xff] }
  0x74   : > { %489 = vst [vmem:[#allocation2 + $0x18] sm:$0xff] %v465_v22  ;;  %v466_v44 = vadd.f32 %v1383_v58, %v422_v23  ;;  %v423_v47 = vadd.f32 %v1399_v1, %v379_v28  ;;  %v380_v48 = vadd.f32 %v1420_v19, %v336_v29  ;;  %v337_v49 = vadd.f32 %v1440_v41, %v302_v20  ;;  %v306_v23 = vld [vmem:[#allocation3 + $0x10] sm:$0xff] }
  0x75   : > { %v1454_v55 = vsel %vm410_vm2, %v405_v21, 0.0  ;;  %v1458_v56 = vsel %vm454_vm3, %v449_v30, 0.0  ;;  %v1462_v57 = vsel %vm322_vm0, %v319_v34, 0.0  ;;  %v1466_v59 = vsel %vm366_vm1, %v362_v35, 0.0  ;;  %v307_v34 = vld [vmem:[#allocation3 + $0x20] sm:$0xff] }
  0x76   : > { %490 = vst [vmem:[#allocation2 + $0x10] sm:$0xff] %v466_v44  ;;  %v467_v60 = vadd.f32 %v1412_v17, %v423_v47  ;;  %v424_v61 = vadd.f32 %v1432_v36, %v380_v48  ;;  %v381_v62 = vadd.f32 %v1444_v42, %v337_v49  ;;  %v338_v2 = vadd.f32 %v1462_v57, %v303_v43 }
  0x77   : > { %v1474_v5 = vsel %vm410_vm2, %v406_v50, 0.0  ;;  %v1478_v12 = vsel %vm454_vm3, %v450_v54, 0.0  ;;  %v339_v13 = vand.u32 2147483647, %v1306_v24  ;;  %v383_v6 = vand.u32 2147483647, %v1310_v25 }
  0x78   : > { %491 = vst [vmem:[#allocation2 + $0x8] sm:$0xff] %v467_v60  ;;  %v468_v7 = vadd.f32 %v1436_v37, %v424_v61  ;;  %v425_v8 = vadd.f32 %v1454_v55, %v381_v62  ;;  %v382_v9 = vadd.f32 %v1466_v59, %v338_v2  ;;  %v427_v10 = vand.u32 2147483647, %v1314_v26  ;;  %v308_v50 = vld [vmem:[#allocation3 + $0x28] sm:$0xff] }
  0x79   : > { %v347_v11 = vadd.f32 %v339_v13, %v304_v4  ;;  %v471_v16 = vand.u32 2147483647, %v1318_v27  ;;  %v340_v15 = vand.u32 2147483647, %v1325_v31  ;;  %v384_v20 = vand.u32 2147483647, %v1329_v32 }
  0x7a   : > { %492 = vst [vmem:[#allocation2 + $0x20] sm:$0xff] %v468_v7  ;;  %v469_v24 = vadd.f32 %v1458_v56, %v425_v8  ;;  %v426_v25 = vadd.f32 %v1474_v5, %v382_v9  ;;  %v428_v21 = vand.u32 2147483647, %v1333_v33  ;;  %v472_v22 = vand.u32 2147483647, %v1341_v38  ;;  %v310_v7 = vld [vmem:[#allocation3 + $0x30] sm:$0xff] }
  0x7b   : > { %v391_v28 = vadd.f32 %v383_v6, %v347_v11  ;;  %v348_v26 = vadd.f32 %v340_v15, %v305_v14  ;;  %v341_v29 = vand.u32 2147483647, %v1345_v39  ;;  %v385_v27 = vand.u32 2147483647, %v1349_v40  ;;  %v311_v14 = vld [vmem:[#allocation3 + $0x38] sm:$0xff] }
  0x7c   : > { %493 = vst [vmem:[#allocation2 + $0x28] sm:$0xff] %v469_v24  ;;  %v470_v31 = vadd.f32 %v1478_v12, %v426_v25  ;;  %v429_v32 = vand.u32 2147483647, %v1356_v45  ;;  %v473_v30 = vand.u32 2147483647, %v1360_v46 }
  0x7d   : > { %v435_v35 = vadd.f32 %v427_v10, %v391_v28  ;;  %v392_v43 = vadd.f32 %v384_v20, %v348_v26  ;;  %v349_v33 = vadd.f32 %v341_v29, %v306_v23  ;;  %v342_v38 = vand.u32 2147483647, %v1368_v51 }
  0x7e   : > { %494 = vst [vmem:[#allocation2 + $0x38] sm:$0xff] %v470_v31  ;;  %v386_v44 = vand.u32 2147483647, %v1372_v52  ;;  %v430_v39 = vand.u32 2147483647, %v1376_v53  ;;  %v309_v52 = vld [vmem:[#allocation3 + $0x8] sm:$0xff] }
  0x7f   : > { %v479_v47 = vadd.f32 %v471_v16, %v435_v35  ;;  %v436_v40 = vadd.f32 %v428_v21, %v392_v43  ;;  %v393_v48 = vadd.f32 %v385_v27, %v349_v33  ;;  %v350_v49 = vadd.f32 %v342_v38, %v307_v34 }
  0x80   : > { %v474_v45 = vand.u32 2147483647, %v1383_v58  ;;  %v343_v46 = vand.u32 2147483647, %v1391_v63  ;;  %v387_v54 = vand.u32 2147483647, %v1395_v0 }
  0x81   : > { %495 = vst [vmem:[#allocation3] sm:$0xff] %v479_v47  ;;  %v480_v60 = vadd.f32 %v472_v22, %v436_v40  ;;  %v437_v61 = vadd.f32 %v429_v32, %v393_v48  ;;  %v394_v51 = vadd.f32 %v386_v44, %v350_v49  ;;  %v431_v62 = vand.u32 2147483647, %v1399_v1 }
  0x82   : > { %v351_v2 = vadd.f32 %v343_v46, %v308_v50  ;;  %v475_v53 = vand.u32 2147483647, %v1412_v17  ;;  %v344_v4 = vand.u32 2147483647, %v1416_v18  ;;  %v388_v13 = vand.u32 2147483647, %v1420_v19 }
  0x83   : > { %496 = vst [vmem:[#allocation3 + $0x18] sm:$0xff] %v480_v60  ;;  %v481_v58 = vadd.f32 %v473_v30, %v437_v61  ;;  %v438_v6 = vadd.f32 %v430_v39, %v394_v51  ;;  %v432_v63 = vand.u32 2147483647, %v1432_v36  ;;  %v476_v0 = vand.u32 2147483647, %v1436_v37 }
  0x84   : > { %v395_v8 = vadd.f32 %v387_v54, %v351_v2  ;;  %v352_v9 = vadd.f32 %v344_v4, %v309_v52  ;;  %v345_v1 = vand.u32 2147483647, %v1440_v41  ;;  %v389_v10 = vand.u32 2147483647, %v1444_v42 }
  0x85   : > { %497 = vst [vmem:[#allocation3 + $0x10] sm:$0xff] %v481_v58  ;;  %v482_v17 = vadd.f32 %v474_v45, %v438_v6  ;;  %v433_v18 = vand.u32 2147483647, %v1454_v55  ;;  %v477_v19 = vand.u32 2147483647, %v1458_v56 }
  0x86   : > { %v439_v11 = vadd.f32 %v431_v62, %v395_v8  ;;  %v396_v16 = vadd.f32 %v388_v13, %v352_v9  ;;  %v353_v15 = vadd.f32 %v345_v1, %v310_v7  ;;  %v346_v36 = vand.u32 2147483647, %v1462_v57 }
  0x87   : > { %498 = vst [vmem:[#allocation3 + $0x20] sm:$0xff] %v482_v17  ;;  %v390_v37 = vand.u32 2147483647, %v1466_v59  ;;  %v434_v20 = vand.u32 2147483647, %v1474_v5 }
  0x88   : > { %v483_v41 = vadd.f32 %v475_v53, %v439_v11  ;;  %v440_v24 = vadd.f32 %v432_v63, %v396_v16  ;;  %v397_v42 = vadd.f32 %v389_v10, %v353_v15  ;;  %v354_v25 = vadd.f32 %v346_v36, %v311_v14 }
  0x89   : > { %v478_v56 = vand.u32 2147483647, %v1478_v12 }
  0x8a   : > { %499 = vst [vmem:[#allocation3 + $0x28] sm:$0xff] %v483_v41  ;;  %v484_v21 = vadd.f32 %v476_v0, %v440_v24  ;;  %v441_v55 = vadd.f32 %v433_v18, %v397_v42  ;;  %v398_v22 = vadd.f32 %v390_v37, %v354_v25 }
  0x8c   : > { %500 = vst [vmem:[#allocation3 + $0x8] sm:$0xff] %v484_v21  ;;  %v485_v23 = vadd.f32 %v477_v19, %v441_v55  ;;  %v442_v28 = vadd.f32 %v434_v20, %v398_v22  ;;  %506 = sbr.rel (%p826_p7) target bundleno = 573 (0x23d), region = 52 }
  0x8e   : > { %501 = vst [vmem:[#allocation3 + $0x30] sm:$0xff] %v485_v23  ;;  %v486_v57 = vadd.f32 %v478_v56, %v442_v28 }
  0x90   : > { %502 = vst [vmem:[#allocation3 + $0x38] sm:$0xff] %v486_v57 }
  0x91   : > { %v507_v59 = vld [vmem:[#allocation2 + $0x30] sm:$0xff]  ;;  %v509_v5 = vld [vmem:[#allocation2 + $0x18] sm:$0xff]  ;;  %v511_v26 = vld [vmem:[#allocation2 + $0x8] sm:$0xff]  ;;  %v1544_v50 = vadd.s32 4294967288, %v1276_v3  ;;  %v1547_v45 = vadd.s32 4294967272, %v1276_v3  ;;  %v1550_v46 = vadd.s32 4294967280, %v1276_v3 }
  0x92   : > { %515 = vadd.xlane.f32.xlu0 %v507_v59  ;;  %519 = vadd.xlane.f32.xlu1 %v509_v5  ;;  %v508_v29 = vld [vmem:[#allocation2] sm:$0xff]  ;;  %v510_v27 = vld [vmem:[#allocation2 + $0x10] sm:$0xff]  ;;  %v513_v12 = vld [vmem:[#allocation2 + $0x28] sm:$0xff]  ;;  %v1553_v2 = vadd.s32 4294967264, %v1276_v3  ;;  %vm591_vm4 = vcmask 130112   ;;  %vm595_vm5 = vcmask 195712  }
  0x93   : > { %523 = vadd.xlane.f32.xlu2 %v511_v26  ;;  %v512_v31 = vld [vmem:[#allocation2 + $0x20] sm:$0xff]  ;;  %v514_v32 = vld [vmem:[#allocation2 + $0x38] sm:$0xff]  ;;  %v577_v34 = vld [vmem:[%s1659_s1 + $0x30] sm:$0xff]  ;;  %vm599_vm6 = vcmask 261312   ;;  %v1560_v63 = vadd.s32 4294967256, %v1276_v3  ;;  %vm603_vm7 = vcmask 326912  }
  0x94   : > { %v578_v30 = vld [vmem:[%s1659_s1 + $0x38] sm:$0xff]  ;;  %v576_v35 = vld [vmem:[%s1659_s1 + $0x28] sm:$0xff]  ;;  %v575_v43 = vld [vmem:[%s1659_s1 + $0x20] sm:$0xff]  ;;  %v1567_v10 = vadd.s32 4294967248, %v1276_v3  ;;  %v1570_v17 = vadd.s32 4294967240, %v1276_v3  ;;  %vm607_vm8 = vcmask 392512  }
  0x95   : > { %628 = vmatpush.msra.mxu0 %v578_v30  ;;  %v574_v33 = vld [vmem:[%s1659_s1 + $0x18] sm:$0xff]  ;;  %v573_v38 = vld [vmem:[%s1659_s1 + $0x10] sm:$0xff]  ;;  %v572_v44 = vld [vmem:[%s1659_s1 + $0x8] sm:$0xff]  ;;  %vm611_vm9 = vcmask 458112   ;;  %vm615_vm10 = vcmask 523712   ;;  %vm617_vm11 = vcmask 523264  }
  0x96   : > { %v571_v39 = vld [vmem:[%s1659_s1] sm:$0xff]  ;;  %vm647_vm12 = vcmask 1043456   ;;  %v540_v21 = vld [vmem:[#allocation3 + $0x18] sm:$0xff]  ;;  %v541_v55 = vld [vmem:[#allocation3 + $0x10] sm:$0xff]  ;;  %vm643_vm13 = vcmask 31744   ;;  %vm715_vm2 = vcmask 516096  }
  0x97   : > { %629 = vmatpush.msra.mxu0 %v577_v34  ;;  %v641_v42 = vld [vmem:[%s1661_s3] sm:$0xf]  ;;  %v543_v56 = vld [vmem:[#allocation3 + $0x28] sm:$0xff]  ;;  %v545_v28 = vld [vmem:[#allocation3 + $0x30] sm:$0xff] }
  0x98   : > { %828 = vmatpush.msk.msra.mxu1 %vm647_vm12, %v641_v42  ;;  %v539_v25 = vld [vmem:[#allocation3] sm:$0xff]  ;;  %v544_v23 = vld [vmem:[#allocation3 + $0x8] sm:$0xff]  ;;  %v546_v57 = vld [vmem:[#allocation3 + $0x38] sm:$0xff] }
  0x99   : > { %630 = vmatpush.msra.mxu0 %v576_v35  ;;  %v542_v22 = vld [vmem:[#allocation3 + $0x20] sm:$0xff] }
  0x9a   : > { %517 = vadd.xlane.f32.xlu0 %v508_v29  ;;  %521 = vadd.xlane.f32.xlu1 %v510_v27  ;;  %v579_v59 = vld [vmem:[%s1660_s2] sm:$0x1] }
  0x9b   : > { %525 = vadd.xlane.f32.xlu2 %v512_v31  ;;  %631 = vmatpush.msra.mxu0 %v575_v43  ;;  %v642_v31 = vld [vmem:[%s1662_s4] sm:$0x1] }
  0x9d   : > { %632 = vmatpush.msra.mxu0 %v574_v33 }
  0x9f   : > { %633 = vmatpush.msra.mxu0 %v573_v38 }
  0xa1   : > { %634 = vmatpush.msra.mxu0 %v572_v44 }
  0xa2   : > { %527 = vadd.xlane.f32.xlu0 %v513_v12  ;;  %529 = vadd.xlane.f32.xlu1 %v514_v32 }
  0xa3   : > { %635 = vmatpush.msra.mxu0 %v571_v39  ;;  %547 = vadd.xlane.f32.xlu2 %v539_v25 }
  0xaa   : > { %549 = vadd.xlane.f32.xlu0 %v540_v21  ;;  %551 = vadd.xlane.f32.xlu1 %v541_v55 }
  0xab   : > { %553 = vadd.xlane.f32.xlu2 %v542_v22 }
  0xb2   : > { %555 = vadd.xlane.f32.xlu0 %v543_v56  ;;  %557 = vadd.xlane.f32.xlu1 %v544_v23 }
  0xb3   : > { %559 = vadd.xlane.f32.xlu2 %v545_v28 }
  0xba   : > { %561 = vadd.xlane.f32.xlu0 %v546_v57 }
 0x105   : > { %v516_v47 = vpop.xlane.xlu0 %515  ;;  %v520_v40 = vpop.xlane.xlu1 %519 }
 0x106   : > { %v524_v48 = vpop.xlane.xlu2 %523  ;;  %v531_v49 = vmul.f32 0.00052083336, %v516_v47  ;;  %v533_v54 = vmul.f32 0.00052083336, %v520_v40 }
 0x107   : > { %v535_v4 = vmul.f32 0.00052083336, %v524_v48 }
 0x108   : > { %v588_v53 = vperm.slane %v531_v49, %v1276_v3  ;;  %v594_v6 = vperm.slane %v533_v54, %v1550_v46 }
 0x109   : > { %v602_v9 = vperm.slane %v535_v4, %v1553_v2 }
 0x10d   : > { %v518_v60 = vpop.xlane.xlu0 %517  ;;  %v522_v61 = vpop.xlane.xlu1 %521 }
 0x10e   : > { %v532_v51 = vmul.f32 0.00052083336, %v518_v60  ;;  %v534_v62 = vmul.f32 0.00052083336, %v522_v61  ;;  %v526_v52 = vpop.xlane.xlu2 %525 }
 0x10f   : > { %v536_v0 = vmul.f32 0.00052083336, %v526_v52 }
 0x110   : > { %v590_v13 = vperm.slane %v532_v51, %v1544_v50  ;;  %v598_v58 = vperm.slane %v534_v62, %v1547_v45 }
 0x111   : > { %v606_v18 = vperm.slane %v536_v0, %v1560_v63 }
 0x112   : > { %v592_v7 = vsel %vm591_vm4, %v590_v13, %v588_v53 }
 0x113   : > { %v596_v8 = vsel %vm595_vm5, %v594_v6, %v592_v7 }
 0x114   : > { %v600_v1 = vsel %vm599_vm6, %v598_v58, %v596_v8 }
 0x115   : > { %v528_v19 = vpop.xlane.xlu0 %527  ;;  %v530_v14 = vpop.xlane.xlu1 %529  ;;  %v604_v15 = vsel %vm603_vm7, %v602_v9, %v600_v1 }
 0x116   : > { %v537_v11 = vmul.f32 0.00052083336, %v528_v19  ;;  %v538_v16 = vmul.f32 0.00052083336, %v530_v14  ;;  %v608_v20 = vsel %vm607_vm8, %v606_v18, %v604_v15  ;;  %v548_v27 = vpop.xlane.xlu2 %547 }
 0x117   : > { %v563_v43 = vmul.f32 0.00052083336, %v548_v27 }
 0x118   : > { %v610_v36 = vperm.slane %v537_v11, %v1567_v10  ;;  %v614_v37 = vperm.slane %v538_v16, %v1570_v17 }
 0x119   : > { %v698_v39 = vperm.slane %v563_v43, %v1276_v3 }
 0x11a   : > { %v612_v41 = vsel %vm611_vm9, %v610_v36, %v608_v20 }
 0x11b   : > { %v616_v24 = vsel %vm615_vm10, %v614_v37, %v612_v41 }
 0x11c   : > { %827 = vmatmul.msk.f32.vlgmr.msra.gmra.mxu0 %vm617_vm11, %v616_v24 }
 0x11d   : > { %v550_v12 = vpop.xlane.xlu0 %549  ;;  %v552_v35 = vpop.xlane.xlu1 %551 }
 0x11e   : > { %v564_v33 = vmul.f32 0.00052083336, %v550_v12  ;;  %v554_v38 = vpop.xlane.xlu2 %553  ;;  %v565_v44 = vmul.f32 0.00052083336, %v552_v35 }
 0x11f   : > { %v566_v48 = vmul.f32 0.00052083336, %v554_v38 }
 0x120   : > { %v699_v47 = vperm.slane %v564_v33, %v1544_v50  ;;  %v701_v54 = vperm.slane %v565_v44, %v1550_v46 }
 0x121   : > { %v703_v52 = vperm.slane %v566_v48, %v1547_v45 }
 0x122   : > { %v700_v60 = vsel %vm591_vm4, %v699_v47, %v698_v39 }
 0x123   : > { %v702_v53 = vsel %vm595_vm5, %v701_v54, %v700_v60 }
 0x124   : > { %v704_v50 = vsel %vm599_vm6, %v703_v52, %v702_v53 }
 0x125   : > { %v556_v40 = vpop.xlane.xlu0 %555  ;;  %v558_v62 = vpop.xlane.xlu1 %557 }
 0x126   : > { %v567_v51 = vmul.f32 0.00052083336, %v556_v40  ;;  %v568_v4 = vmul.f32 0.00052083336, %v558_v62  ;;  %v560_v13 = vpop.xlane.xlu2 %559 }
 0x127   : > { %v569_v58 = vmul.f32 0.00052083336, %v560_v13 }
 0x128   : > { %v705_v3 = vperm.slane %v567_v51, %v1553_v2  ;;  %v707_v46 = vperm.slane %v568_v4, %v1560_v63 }
 0x129   : > { %v709_v45 = vperm.slane %v569_v58, %v1567_v10 }
 0x12a   : > { %v706_v8 = vsel %vm603_vm7, %v705_v3, %v704_v50 }
 0x12b   : > { %v708_v18 = vsel %vm607_vm8, %v707_v46, %v706_v8 }
 0x12c   : > { %v710_v16 = vsel %vm611_vm9, %v709_v45, %v708_v18 }
 0x12d   : > { %v562_v6 = vpop.xlane.xlu0 %561 }
 0x12e   : > { %v570_v9 = vmul.f32 0.00052083336, %v562_v6 }
 0x130   : > { %v711_v11 = vperm.slane %v570_v9, %v1570_v17 }
 0x132   : > { %v712_v10 = vsel %vm615_vm10, %v711_v11, %v710_v16 }
 0x199   : > { %v637_v5 = vpop.f32.mrf.mxu0 }
 0x19a   : > { %v638_v26 = vadd.f32 %v637_v5, %v579_v59 }
 0x19c   : > { %v640_v29 = vmax.f32 %v638_v26, 0.0 }
 0x19e   : > { %829 = vmatmul.msk.f32.vlgmr.msra.gmra.mxu1 %vm643_vm13, %v640_v29 }
 0x21b   : > { %v668_v32 = vpop.f32.mrf.mxu1 }
 0x21c   : > { %v669_v30 = vadd.f32 %v668_v32, %v642_v31 }
 0x21e   : > { %v830_v34 = vmul.f32 -1.442695, %v669_v30 }
 0x220   : > { %935 = vpow2.f32 %v830_v34 }
 0x226   : > { %v936_v49 = vpop.eup %935 }
 0x227   : > { %v674_v61 = vadd.f32 1.0, %v936_v49 }
 0x229   : > { %937 = vrcp.f32 %v674_v61  ;;  %v686_v19 = vand.u32 2147483648, %v674_v61  ;;  %v684_v2 = vand.u32 2147483647, %v674_v61  ;;  %vm680_vm15 = vweird.f32 %v674_v61 }
 0x22b   : > { %v687_v63 = vor.u32 1.1754944e-38, %v686_v19  ;;  %vm685_vm1 = vcmp.eq.f32.partialorder %v684_v2, 8.507059e+37 }
 0x22f   : > { %v938_v0 = vpop.eup %937 }
 0x230   : > { %v676_v7 = vmul.f32 %v938_v0, %v674_v61  ;;  %vm681_vm14 = vweird.f32 %v938_v0 }
 0x231   : > { %vm682_vm0 = vmor %vm680_vm15, %vm681_vm14 }
 0x232   : > { %v677_v1 = vsub.f32 1.0, %v676_v7 }
 0x234   : > { %v678_v14 = vmul.f32 %v938_v0, %v677_v1 }
 0x236   : > { %v679_v15 = vadd.f32 %v938_v0, %v678_v14 }
 0x238   : > { %v683_v36 = vsel %vm682_vm0, %v938_v0, %v679_v15 }
 0x239   : > { %v688_v37 = vsel %vm685_vm1, %v687_v63, %v683_v36 }
 0x23a   : > { %v714_v20 = vmul.f32 %v712_v10, %v688_v37 }
 0x23c   : > { %716 = vst.msk [vmem:[%s1272_s7] sm:$0x1] %vm715_vm2, %v714_v20 }
 0x23d PF: > { %s726_s14 = scalar_lea.hbm %s1663_s5, %s1088_s25  ;;  %s728_s30 = sshll.u32 %s1272_s7, 4  ;;  %s729_s30 = int_to_ptr.vmem [resolvable:$true] %s728_s30 }
 0x23e   : > { %s730_s6 = sshll.u32 %s726_s14, 4  ;;  %s718_s26 = scalar_lea.sflag [#allocation6], %s266_s23  ;;  %s731_s6 = int_to_ptr.hbm [resolvable:$true] %s730_s6 }
 0x23f   : > { %s992_s16 = sshra.s32 %s731_s6, 4  ;;  %s998_s15 = scalar_lea.hbm %s1663_s5, 2  ;;  %s993_s16 = int_to_ptr.hbm [resolvable:$true] %s992_s16 }
 0x240   : > { %s994_s18 = scalar_lea.hbm %s993_s16, 1  ;;  %p999_p6 = scmp.lt.s32.totalorder %s993_s16, %s1663_s5 }
 0x241   : > { %p995_p4 = scmp.ne.s32.totalorder %s993_s16, %s994_s18  ;;  %p1000_p8 = scmp.lt.s32.totalorder %s998_s15, %s994_s18 }
 0x243   : > { %p996_p3 = pnand %p995_p4, %p1218_p12  ;;  %p1001_p9 = por %p1000_p8, %p999_p6 }
 0x245   : > { %p997_p5 = pneg %p996_p3 }
 0x247   : > { %p1002_p10 = pnand %p1001_p9, %p997_p5 }
 0x249   : > { %1005 = shalt.err (!%p1002_p10)
}
 0x24a   : > { %837 = dma.vmem_to_hbm [thread:$0]  (%p1218_p12), %s729_s30, 16, %s731_s6, %s718_s26  }
 0x24b PF: > { %s1691_s25 = sld [smem:[#allocation10_spill]]  ;;  %p843_p11 = scmp.ge.s32.totalorder %s1100_s28, 2 }
 0x24d   : > { %p840_p13 = pnand %p843_p11, %p1230_p1 }
 0x24f   : > { %p841_p0 = pneg %p840_p13 }
 0x251   : > { %s742_s7 = sand.u32 1, %s1691_s25  }
 0x252   : > { %s743_s21 = scalar_lea.sflag [#allocation6], %s742_s7 }
 0x253   : > { %1055 = dma.done.wait (%p841_p0), %s743_s21, 16  }
 0x254   : > { %1057 = vsyncadd (%p841_p0), %s743_s21, 4294967280  ;;  %s21_s28 = sadd.s32 1, %s1100_s28   ;;  %s1693_s9 = sld [smem:[#allocation11_spill]] }
 0x255   : > { %p18_p2 = scmp.ge.s32.totalorder %s21_s28, 10   ;;  %s1694_s20 = sld [smem:[#allocation18_spill]] }
 0x256   : > { %s1695_s13 = sld [smem:[#allocation12_spill]]  ;;  %s1701_s18 = smov %s1064_s19 }
 0x257   : > { %s1696_s23 = sld [smem:[#allocation19_spill]]  ;;  %s1703_s21 = smov %s1076_s22 }
 0x258   : > { %s1697_s24 = sld [smem:[#allocation13_spill]]  ;;  %20 = sbr.rel (!%p18_p2) target bundleno = 9 (0x9), region = 93 }
 0x259   : > { %s1698_s25 = sld [smem:[#allocation14_spill]] }
 0x25a   : > { %s1699_s26 = sld [smem:[#allocation15_spill]]  ;;  %s1702_s19 = smov %s1693_s9 }
 0x25b   : > { %s1700_s27 = sld [smem:[#allocation16_spill]] }
 0x25c   : > { %s1704_s22 = smov %s1695_s13 }
 0x25d   :  { %748 = vsyncpa [#allocation5], 1 }
 0x25e   :  { %750 = vsyncpa [#allocation5 + $0x1], 1 }
 0x25f   :  { %751 = vsyncpa [#allocation6], 1 }
 0x260   :  { %753 = vsyncpa [#allocation6 + $0x1], 1 }

</bundles_post_ra>
